<compile_context>
chip_gen: v7x
topology: tpu7x:2x2x1
jax: 0.10.0
libtpu: 0.0.40
codegen_flags: <defaults>
</compile_context>

<pallas_src>
import numpy as np
import jax
import jax.numpy as jnp
from jax.experimental import pallas as pl
from jax.experimental.pallas import tpu as pltpu


def _round_up(n, m):
    return ((n + m - 1) // m) * m


def _branch_kernel(x_ref, w1_ref, b1_ref, w2_ref, b2_ref,
                   w3_ref, b3_ref, w4_ref, b4_ref, o_ref):
    # Scale n*a1 (==1.0) is folded into the weights/biases; no scalar operand.
    h = jnp.tanh(jnp.dot(x_ref[...], w1_ref[...],
                         preferred_element_type=jnp.float32) + b1_ref[...])
    h = jnp.tanh(jnp.dot(h, w2_ref[...],
                         preferred_element_type=jnp.float32) + b2_ref[...])
    h = jnp.tanh(jnp.dot(h, w3_ref[...],
                         preferred_element_type=jnp.float32) + b3_ref[...])
    # w4/b4 are zero-padded to a lane-dense (128-wide) output -> unmasked vst.
    o_ref[...] = jnp.dot(h, w4_ref[...],
                         preferred_element_type=jnp.float32) + b4_ref[...]


def branch_net_forward(x, params, *, block_batch=128):
    """x: (B, D_in) float32.  params: dict with w1..w4, b1..b4 (scale folded)."""
    w1, b1 = params["w1"], params["b1"]
    w2, b2 = params["w2"], params["b2"]
    w3, b3 = params["w3"], params["b3"]
    w4, b4 = params["w4"], params["b4"]

    B, D_in = x.shape
    H = w1.shape[1]
    D_out = w4.shape[1]

    LANE = 128
    D_out_p = _round_up(max(D_out, LANE), LANE)

    # Zero-pad the last layer to a lane-dense output width (free MXU columns).
    w4p = jnp.pad(w4, ((0, 0), (0, D_out_p - D_out)))
    b4p = jnp.pad(b4, ((0, 0), (0, D_out_p - D_out)))

    # Batch tile: multiple of 8 sublanes; pad the batch so the grid is exact.
    TB = min(block_batch, _round_up(B, 8))
    Bp = _round_up(B, TB)
    xp = jnp.pad(x, ((0, Bp - B), (0, 0))) if Bp != B else x

    grid = (Bp // TB,)

    out = pl.pallas_call(
        _branch_kernel,
        out_shape=jax.ShapeDtypeStruct((Bp, D_out_p), jnp.float32),
        grid_spec=pltpu.PrefetchScalarGridSpec(
            num_scalar_prefetch=0,
            grid=grid,
            in_specs=[
                # x: one batch tile per grid step (double-buffered by Pallas).
                pl.BlockSpec((TB, D_in), lambda i: (i, 0)),
                # Weights / biases: constant index_map -> stay VMEM-resident.
                pl.BlockSpec((D_in, H), lambda i: (0, 0)),
                pl.BlockSpec((1, H), lambda i: (0, 0)),
                pl.BlockSpec((H, H), lambda i: (0, 0)),
                pl.BlockSpec((1, H), lambda i: (0, 0)),
                pl.BlockSpec((H, H), lambda i: (0, 0)),
                pl.BlockSpec((1, H), lambda i: (0, 0)),
                pl.BlockSpec((H, D_out_p), lambda i: (0, 0)),
                pl.BlockSpec((1, D_out_p), lambda i: (0, 0)),
            ],
            out_specs=pl.BlockSpec((TB, D_out_p), lambda i: (i, 0)),
        ),
        compiler_params=pltpu.CompilerParams(
            # Batch axis is embarrassingly parallel -> megacore sharding on v7x.
            dimension_semantics=("parallel",),
            # Sized for the smallest chip (v7x: 32 MiB scoped default);
            # actual footprint at TB=128 is well under 2 MiB.
            vmem_limit_bytes=32 * 1024 * 1024,
        ),
    )(xp, w1, b1, w2, b2, w3, b3, w4p, b4p)

    # Strip batch padding and the lane padding of the output.
    return out[:B, :D_out]


def make_params(key, D_in, H, D_out):
    """Deterministic init mirroring the PyTorch module's normal_ init.

    The n*a1 scale (exactly 1.0 since n = 1/a1) is folded into every layer's
    weight and bias, so the kernel needs no scalar operand.
    """
    ks = jax.random.split(key, 8)

    def normal(k, shape, std):
        return std * jax.random.normal(k, shape, dtype=jnp.float32)

    a1 = jnp.float32(0.2)
    n = 1.0 / a1
    scale = n * a1                      # == 1.0 exactly in f32; folded below.

    # Stored transposed relative to torch: (in, out).
    w1 = scale * normal(ks[0], (D_in, H), np.sqrt(2.0 / (D_in + H)))
    w2 = scale * normal(ks[1], (H, H),    np.sqrt(2.0 / (H + H)))
    w3 = scale * normal(ks[2], (H, H),    np.sqrt(2.0 / (H + H)))
    w4 = scale * normal(ks[3], (H, D_out), np.sqrt(2.0 / (H + D_out)))
    b1 = scale * normal(ks[4], (1, H), 1.0)
    b2 = scale * normal(ks[5], (1, H), 1.0)
    b3 = scale * normal(ks[6], (1, H), 1.0)
    b4 = scale * normal(ks[7], (1, D_out), 1.0)

    return dict(w1=w1, b1=b1, w2=w2, b2=b2, w3=w3, b3=b3, w4=w4, b4=b4)


def reference_forward(x, p):
    y1 = jnp.tanh(x @ p["w1"] + p["b1"])
    y2 = jnp.tanh(y1 @ p["w2"] + p["b2"])
    y3 = jnp.tanh(y2 @ p["w3"] + p["b3"])
    return y3 @ p["w4"] + p["b4"]


if __name__ == "__main__":
    key = jax.random.PRNGKey(0)
    k_params, k_x = jax.random.split(key)

    # Branch net input: [a, b, Mt, G] -> D_in = 4; small hidden/output dims.
    # B=300 is non-divisible by the 128-row tile to exercise padding + a
    # multi-step grid (3 tiles).
    B, D_in, H, D_out = 300, 4, 32, 16

    params = make_params(k_params, D_in, H, D_out)
    x = jax.random.normal(k_x, (B, D_in), dtype=jnp.float32)

    y = branch_net_forward(x, params, block_batch=128)
    y = jax.block_until_ready(y)

    y_ref = reference_forward(x, params)
    np.testing.assert_allclose(np.asarray(y), np.asarray(y_ref),
                               rtol=1e-5, atol=1e-5)

    print("KERNEL_OK")
</pallas_src>

<mosaic_0001>
module attributes {stable_mosaic.version = 11 : i64} {
  func.func @_branch_kernel(%arg0: i32, %arg1: memref<128x4xf32, #tpu.memory_space<vmem>>, %arg2: memref<4x32xf32, #tpu.memory_space<vmem>>, %arg3: memref<1x32xf32, #tpu.memory_space<vmem>>, %arg4: memref<32x32xf32, #tpu.memory_space<vmem>>, %arg5: memref<1x32xf32, #tpu.memory_space<vmem>>, %arg6: memref<32x32xf32, #tpu.memory_space<vmem>>, %arg7: memref<1x32xf32, #tpu.memory_space<vmem>>, %arg8: memref<32x128xf32, #tpu.memory_space<vmem>>, %arg9: memref<1x128xf32, #tpu.memory_space<vmem>>, %arg10: memref<128x128xf32, #tpu.memory_space<vmem>>) attributes {dimension_semantics = [#tpu.dimension_semantics<parallel>], iteration_bounds = array<i64: 3>, scalar_prefetch = 0 : i64, scratch_operands = 0 : i64, tpu.core_type = #tpu.core_type<tc>, window_params = [{transform_indices = @transform_0, window_bounds = array<i64: 128, 4>}, {pipeline_mode = #tpu.pipeline_mode<synchronous>, transform_indices = @transform_1, window_bounds = array<i64: 4, 32>}, {pipeline_mode = #tpu.pipeline_mode<synchronous>, transform_indices = @transform_2, window_bounds = array<i64: 1, 32>}, {pipeline_mode = #tpu.pipeline_mode<synchronous>, transform_indices = @transform_3, window_bounds = array<i64: 32, 32>}, {pipeline_mode = #tpu.pipeline_mode<synchronous>, transform_indices = @transform_4, window_bounds = array<i64: 1, 32>}, {pipeline_mode = #tpu.pipeline_mode<synchronous>, transform_indices = @transform_5, window_bounds = array<i64: 32, 32>}, {pipeline_mode = #tpu.pipeline_mode<synchronous>, transform_indices = @transform_6, window_bounds = array<i64: 1, 32>}, {pipeline_mode = #tpu.pipeline_mode<synchronous>, transform_indices = @transform_7, window_bounds = array<i64: 32, 128>}, {pipeline_mode = #tpu.pipeline_mode<synchronous>, transform_indices = @transform_8, window_bounds = array<i64: 1, 128>}, {transform_indices = @transform_9, window_bounds = array<i64: 128, 128>}]} {
    %c0 = arith.constant 0 : index
    %c0_0 = arith.constant 0 : index
    %0 = vector.load %arg1[%c0, %c0_0] : memref<128x4xf32, #tpu.memory_space<vmem>>, vector<128x4xf32>
    %c0_1 = arith.constant 0 : index
    %c0_2 = arith.constant 0 : index
    %1 = vector.load %arg2[%c0_1, %c0_2] : memref<4x32xf32, #tpu.memory_space<vmem>>, vector<4x32xf32>
    %cst = arith.constant dense<0.000000e+00> : vector<128x32xf32>
    %2 = tpu.matmul %0, %1, %cst {dimension_numbers = #tpu.dot_dimension_numbers<[1], [0], [0], [1], [0, 0, 1, 1], [], []>} : vector<128x4xf32>, vector<4x32xf32>, vector<128x32xf32> -> vector<128x32xf32>
    %c0_3 = arith.constant 0 : index
    %c0_4 = arith.constant 0 : index
    %3 = vector.load %arg3[%c0_3, %c0_4] : memref<1x32xf32, #tpu.memory_space<vmem>>, vector<1x32xf32>
    %4 = vector.broadcast %3 : vector<1x32xf32> to vector<128x32xf32>
    %5 = arith.addf %2, %4 : vector<128x32xf32>
    %6 = math.tanh %5 : vector<128x32xf32>
    %c0_5 = arith.constant 0 : index
    %c0_6 = arith.constant 0 : index
    %7 = vector.load %arg4[%c0_5, %c0_6] : memref<32x32xf32, #tpu.memory_space<vmem>>, vector<32x32xf32>
    %cst_7 = arith.constant dense<0.000000e+00> : vector<128x32xf32>
    %8 = tpu.matmul %6, %7, %cst_7 {dimension_numbers = #tpu.dot_dimension_numbers<[1], [0], [0], [1], [0, 0, 1, 1], [], []>} : vector<128x32xf32>, vector<32x32xf32>, vector<128x32xf32> -> vector<128x32xf32>
    %c0_8 = arith.constant 0 : index
    %c0_9 = arith.constant 0 : index
    %9 = vector.load %arg5[%c0_8, %c0_9] : memref<1x32xf32, #tpu.memory_space<vmem>>, vector<1x32xf32>
    %10 = vector.broadcast %9 : vector<1x32xf32> to vector<128x32xf32>
    %11 = arith.addf %8, %10 : vector<128x32xf32>
    %12 = math.tanh %11 : vector<128x32xf32>
    %c0_10 = arith.constant 0 : index
    %c0_11 = arith.constant 0 : index
    %13 = vector.load %arg6[%c0_10, %c0_11] : memref<32x32xf32, #tpu.memory_space<vmem>>, vector<32x32xf32>
    %cst_12 = arith.constant dense<0.000000e+00> : vector<128x32xf32>
    %14 = tpu.matmul %12, %13, %cst_12 {dimension_numbers = #tpu.dot_dimension_numbers<[1], [0], [0], [1], [0, 0, 1, 1], [], []>} : vector<128x32xf32>, vector<32x32xf32>, vector<128x32xf32> -> vector<128x32xf32>
    %c0_13 = arith.constant 0 : index
    %c0_14 = arith.constant 0 : index
    %15 = vector.load %arg7[%c0_13, %c0_14] : memref<1x32xf32, #tpu.memory_space<vmem>>, vector<1x32xf32>
    %16 = vector.broadcast %15 : vector<1x32xf32> to vector<128x32xf32>
    %17 = arith.addf %14, %16 : vector<128x32xf32>
    %18 = math.tanh %17 : vector<128x32xf32>
    %c0_15 = arith.constant 0 : index
    %c0_16 = arith.constant 0 : index
    %19 = vector.load %arg8[%c0_15, %c0_16] : memref<32x128xf32, #tpu.memory_space<vmem>>, vector<32x128xf32>
    %cst_17 = arith.constant dense<0.000000e+00> : vector<128x128xf32>
    %20 = tpu.matmul %18, %19, %cst_17 {dimension_numbers = #tpu.dot_dimension_numbers<[1], [0], [0], [1], [0, 0, 1, 1], [], []>} : vector<128x32xf32>, vector<32x128xf32>, vector<128x128xf32> -> vector<128x128xf32>
    %c0_18 = arith.constant 0 : index
    %c0_19 = arith.constant 0 : index
    %21 = vector.load %arg9[%c0_18, %c0_19] : memref<1x128xf32, #tpu.memory_space<vmem>>, vector<1x128xf32>
    %22 = vector.broadcast %21 : vector<1x128xf32> to vector<128x128xf32>
    %23 = arith.addf %20, %22 : vector<128x128xf32>
    %c0_20 = arith.constant 0 : index
    %c0_21 = arith.constant 0 : index
    %24 = vector.load %arg10[%c0_20, %c0_21] : memref<128x128xf32, #tpu.memory_space<vmem>>, vector<128x128xf32>
    tpu.vector_store %arg10[%c0_20, %c0_21], %23 {strides = array<i32>} : memref<128x128xf32, #tpu.memory_space<vmem>>, vector<128x128xf32>,
    return
  }
  func.func @transform_0(%arg0: i32) -> (i32, i32) {
    %c0_i32 = arith.constant 0 : i32
    %c0_i32_0 = arith.constant 0 : i32
    return %arg0, %c0_i32 : i32, i32
  }
  func.func @transform_1(%arg0: i32) -> (i32, i32) {
    %c0_i32 = arith.constant 0 : i32
    %c0_i32_0 = arith.constant 0 : i32
    %c0_i32_1 = arith.constant 0 : i32
    return %c0_i32, %c0_i32_0 : i32, i32
  }
  func.func @transform_2(%arg0: i32) -> (i32, i32) {
    %c0_i32 = arith.constant 0 : i32
    %c0_i32_0 = arith.constant 0 : i32
    %c0_i32_1 = arith.constant 0 : i32
    return %c0_i32, %c0_i32_0 : i32, i32
  }
  func.func @transform_3(%arg0: i32) -> (i32, i32) {
    %c0_i32 = arith.constant 0 : i32
    %c0_i32_0 = arith.constant 0 : i32
    %c0_i32_1 = arith.constant 0 : i32
    return %c0_i32, %c0_i32_0 : i32, i32
  }
  func.func @transform_4(%arg0: i32) -> (i32, i32) {
    %c0_i32 = arith.constant 0 : i32
    %c0_i32_0 = arith.constant 0 : i32
    %c0_i32_1 = arith.constant 0 : i32
    return %c0_i32, %c0_i32_0 : i32, i32
  }
  func.func @transform_5(%arg0: i32) -> (i32, i32) {
    %c0_i32 = arith.constant 0 : i32
    %c0_i32_0 = arith.constant 0 : i32
    %c0_i32_1 = arith.constant 0 : i32
    return %c0_i32, %c0_i32_0 : i32, i32
  }
  func.func @transform_6(%arg0: i32) -> (i32, i32) {
    %c0_i32 = arith.constant 0 : i32
    %c0_i32_0 = arith.constant 0 : i32
    %c0_i32_1 = arith.constant 0 : i32
    return %c0_i32, %c0_i32_0 : i32, i32
  }
  func.func @transform_7(%arg0: i32) -> (i32, i32) {
    %c0_i32 = arith.constant 0 : i32
    %c0_i32_0 = arith.constant 0 : i32
    %c0_i32_1 = arith.constant 0 : i32
    return %c0_i32, %c0_i32_0 : i32, i32
  }
  func.func @transform_8(%arg0: i32) -> (i32, i32) {
    %c0_i32 = arith.constant 0 : i32
    %c0_i32_0 = arith.constant 0 : i32
    %c0_i32_1 = arith.constant 0 : i32
    return %c0_i32, %c0_i32_0 : i32, i32
  }
  func.func @transform_9(%arg0: i32) -> (i32, i32) {
    %c0_i32 = arith.constant 0 : i32
    %c0_i32_0 = arith.constant 0 : i32
    return %arg0, %c0_i32 : i32, i32
  }
}

</mosaic_0001>

<bundles_post_ra>
// kernel: tpu_custom_call.1
= control target key start
LH: loop header
LB: loop body
LE: loop exit
PB: predicated region body
PF: predicated region fallthrough
CT: control target
= control target key end

     0   :  { %14 = vsyncpa [#allocation3], 0  ;;  %s2180_s0 = inlined_call_operand.vmem [shape: f32[384,4], index: 0, kind: input, shape index: {}]   ;;  %s2181_s1 = inlined_call_operand.vmem [shape: f32[4,32], index: 1, kind: input, shape index: {}]   ;;  %s2182_s2 = inlined_call_operand.vmem [shape: f32[1,32], index: 2, kind: input, shape index: {}]   ;;  %s2183_s3 = inlined_call_operand.vmem [shape: f32[32,32], index: 3, kind: input, shape index: {}]   ;;  %s2184_s4 = inlined_call_operand.vmem [shape: f32[1,32], index: 4, kind: input, shape index: {}]   ;;  %s2185_s5 = inlined_call_operand.vmem [shape: f32[32,32], index: 5, kind: input, shape index: {}]   ;;  %s2186_s6 = inlined_call_operand.vmem [shape: f32[1,32], index: 6, kind: input, shape index: {}]   ;;  %s2187_s7 = inlined_call_operand.vmem [shape: f32[32,128], index: 7, kind: input, shape index: {}]   ;;  %s2188_s8 = inlined_call_operand.vmem [shape: f32[1,128], index: 8, kind: input, shape index: {}]   ;;  %s2189_s9 = inlined_call_operand.hbm [shape: f32[384,128], index: 9, kind: output, shape index: {}]  }
   0x1   :  { %16 = vsyncpa [#allocation3 + $0x1], 0  ;;  %s1868_s30 = smov 0   ;;  %s1870_s10 = smov 0  }
   0x2   :  { %s1872_s11 = smov 0   ;;  %s1874_s12 = smov 0  }
   0x3 LB: > { %s1889_s13 = sadd.s32 4294967295, %s1813_s12   ;;  %s1309_s14 = sadd.s32 4294967294, %s1813_s12   ;;  %s1813_s12 = sphi %s1874_s12, %s2195_s12   ;;  %s1809_s11 = sphi %s1872_s11, %s2194_s11   ;;  %s1805_s10 = sphi %s1870_s10, %s2193_s10   ;;  %s1801_s30 = sphi %s1868_s30, %s2192_s30  }
   0x4   : > { %s1893_s15 = sadd.s32 1, %s1813_s12   ;;  %s223_s16 = sadd.s32 1, %s1809_s11 }
   0x5   : > { %s220_s17 = ssub.s32 %s1813_s12, %s1893_s15  ;;  %p233_p0 = scmp.ne.s32.totalorder %s1809_s11, %s1805_s10 }
   0x6   : > { %p221_p1 = scmp.eq.s32.totalorder %s220_s17, 0  ;;  %p234_p2 = scmp.eq.s32.totalorder %s1889_s13, 2 }
   0x7   : > { %p239_p3 = scmp.ne.s32.totalorder %s1805_s10, %s1801_s30  ;;  %p240_p4 = scmp.eq.s32.totalorder %s1309_s14, 2 }
   0x8   : > { %s1904_s18 = scalar_select %p221_p1, %s1809_s11, %s223_s16  }
   0x9   : > { %p1906_p5 = por %p234_p2, %p233_p0  ;;  %p1910_p6 = por %p240_p4, %p239_p3 }
   0xa   : > { %p1312_p7 = scmp.ge.s32.totalorder %s1813_s12, 1  ;;  %p291_p8 = scmp.lt.s32.totalorder %s1813_s12, 4 }
   0xc   : > { %p292_p9 = pnand %p1312_p7, %p291_p8 }
   0xd   : > { %v350_v0 = vld [vmem:[%s2181_s1] sm:$0xf] (!%p292_p9)  ;;  %vm407_vm0 = vcmask (!%p292_p9), 1043456   ;;  %s1314_s23 = sshll.u32 (!%p292_p9), %s1889_s13, 4  ;;  %vm358_vm1 = vcmask (!%p292_p9), 31744   ;;  %v573_v18 = vld [vmem:[%s2183_s3 + $0x8] sm:$0xff] (!%p292_p9) }
   0xe   : > { %295 = sbr.rel (%p292_p9) target bundleno = 965 (0x3c5), region = 56  ;;  %1468 = vmatprep.subr.msk.mxu0 (!%p292_p9), %vm407_vm0, %v350_v0  ;;  %p328_p10 = scmp.lt.s32.totalorder (!%p292_p9), %s1314_s23, 47  ;;  %v572_v17 = vld [vmem:[%s2183_s3] sm:$0xff] (!%p292_p9)  ;;  %v574_v20 = vld [vmem:[%s2183_s3 + $0x10] sm:$0xff] (!%p292_p9)  ;;  %v575_v21 = vld [vmem:[%s2183_s3 + $0x18] sm:$0xff] (!%p292_p9)  ;;  %vm583_vm2 = vcmask (!%p292_p9), 261120  }
   0xf   : > { %1469 = vmatpush3.msk.msra.mxu0 (!%p292_p9), %vm407_vm0, %v350_v0  ;;  %v1590_v19 = vpack.c.bf16 (!%p292_p9), %v573_v18, %v572_v17  ;;  %v1594_v22 = vpack.c.bf16 (!%p292_p9), %v575_v21, %v574_v20  ;;  %v793_v23 = vld [vmem:[%s2185_s5] sm:$0xff] (!%p292_p9)  ;;  %v794_v24 = vld [vmem:[%s2185_s5 + $0x8] sm:$0xff] (!%p292_p9)  ;;  %v795_v25 = vld [vmem:[%s2185_s5 + $0x10] sm:$0xff] (!%p292_p9)  ;;  %s324_s22 = sand.u32 (!%p292_p9), 1, %s1805_s10   ;;  %s1815_s21 = smov (!%p292_p9), [#allocation2]  }
  0x10   : > { %v1598_v26 = vpack.c.bf16 (!%p292_p9), %v794_v24, %v793_v23  ;;  %v796_v27 = vld [vmem:[%s2185_s5 + $0x18] sm:$0xff] (!%p292_p9)  ;;  %v1984_v29 = vld [vmem:[%s2182_s2] ss:$0 sm:$0xff] (!%p292_p9) }
  0x11   : > { %1591 = vmatprep.subr.bf16.mxu1 (!%p292_p9), %v1590_v19  ;;  %v1602_v28 = vpack.c.bf16 (!%p292_p9), %v796_v27, %v795_v25  ;;  %v1016_v18 = vld [vmem:[%s2187_s7 + $0x18] sm:$0xff] (!%p292_p9)  ;;  %v2033_v20 = vld [vmem:[%s2184_s4] ss:$0 sm:$0xff] (!%p292_p9) }
  0x12   : > { %1593 = vmatpush3.bf16.msra.mxu1 (!%p292_p9), %v1590_v19  ;;  %1599 = vmatprep.subr.bf16.mxu0 (!%p292_p9), %v1598_v26 }
  0x13   : > { %1595 = vmatprep.subr.bf16.mxu1 (!%p292_p9), %v1594_v22 }
  0x15   : > { %s2197_s23 = smov (!%p328_p10, %s1314_s23), 47 }
  0x16   : > { %s1315_s24 = sshll.u32 %s2197_s23, 3  ;;  %1597 = vmatpush3.bf16.msra.mxu1 %v1594_v22  ;;  %s1313_s23 = sshll.u32 %s324_s22, 7 }
  0x17   : > { %s1923_s27 = scalar_lea.vmem %s2180_s0, %s1315_s24  ;;  %s2110_s26 = scalar_lea.vmem [#allocation2], %s1313_s23 }
  0x18   : > { %v334_v1 = vld [vmem:[%s1923_s27] sm:$0xff]  ;;  %v335_v2 = vld [vmem:[%s1923_s27 + $0x8] sm:$0xff]  ;;  %v336_v3 = vld [vmem:[%s1923_s27 + $0x10] sm:$0xff]  ;;  %s1247_s28 = sshll.u32 %s2110_s26, 4  ;;  %s1755_s23 = sshll.u32 %s1815_s21, 4  ;;  %s2133_s28 = int_to_ptr.vmem [resolvable:$true] %s1247_s28  ;;  %s1756_s23 = int_to_ptr.vmem [resolvable:$false] %s1755_s23 }
  0x19   : > { %1470 = vmatprep.mubr.msk.f32.mxu0 %vm358_vm1, %v334_v1  ;;  %v337_v4 = vld [vmem:[%s1923_s27 + $0x18] sm:$0xff]  ;;  %v338_v5 = vld [vmem:[%s1923_s27 + $0x20] sm:$0xff]  ;;  %v339_v6 = vld [vmem:[%s1923_s27 + $0x28] sm:$0xff]  ;;  %s1751_s17 = scalar_lea.vmem %s2133_s28, 2048  ;;  %s1757_s24 = scalar_lea.vmem %s1756_s23, 4096 }
  0x1a   : > { %1471 = vmatmul.mubr.msk.f32.vlgmr.msra.gmra.mrb[0].mxu0 %vm358_vm1, %v335_v2  ;;  %v340_v7 = vld [vmem:[%s1923_s27 + $0x30] sm:$0xff]  ;;  %v341_v8 = vld [vmem:[%s1923_s27 + $0x38] sm:$0xff]  ;;  %v342_v9 = vld [vmem:[%s1923_s27 + $0x40] sm:$0xff]  ;;  %p1752_p11 = scmp.ne.s32.totalorder %s2133_s28, %s1751_s17  ;;  %p1758_p0 = scmp.lt.s32.totalorder %s2133_s28, %s1756_s23 }
  0x1b   : > { %1473 = vmatprep.mubr.msk.f32.mxu0 %vm358_vm1, %v336_v3  ;;  %v343_v10 = vld [vmem:[%s1923_s27 + $0x48] sm:$0xff]  ;;  %v344_v11 = vld [vmem:[%s1923_s27 + $0x50] sm:$0xff]  ;;  %v345_v12 = vld [vmem:[%s1923_s27 + $0x58] sm:$0xff]  ;;  %1601 = vmatpush3.bf16.msra.mxu0 %v1598_v26  ;;  %p1759_p1 = scmp.lt.s32.totalorder %s1757_s24, %s1751_s17 }
  0x1c   : > { %v346_v13 = vld [vmem:[%s1923_s27 + $0x60] sm:$0xff]  ;;  %v347_v14 = vld [vmem:[%s1923_s27 + $0x68] sm:$0xff]  ;;  %v348_v15 = vld [vmem:[%s1923_s27 + $0x70] sm:$0xff]  ;;  %1603 = vmatprep.subr.bf16.mxu0 %v1602_v28  ;;  %p1753_p12 = pnand %p1752_p11, %p1906_p5 }
  0x1d   : > { %v349_v16 = vld [vmem:[%s1923_s27 + $0x78] sm:$0xff]  ;;  %s1390_s27 = sshll.u32 %s1889_s13, 11  ;;  %s2139_s13 = scalar_lea.sflag [#allocation3], %s324_s22 }
  0x1e   : > { %1474 = vmatmul.mubr.msk.f32.gmra.mrb[2].mxu0 %vm358_vm1, %v337_v4  ;;  %s2131_s16 = scalar_lea.hbm %s2189_s9, %s1390_s27  ;;  %p1754_p13 = pneg %p1753_p12 }
  0x1f   : > { %1476 = vmatprep.mubr.msk.f32.mxu0 %vm358_vm1, %v338_v5  ;;  %1605 = vmatpush3.bf16.msra.mxu0 %v1602_v28  ;;  %p1760_p2 = por %p1759_p1, %p1758_p0 }
  0x21   : > { %p1761_p3 = pnand %p1760_p2, %p1754_p13 }
  0x22   : > { %1477 = vmatmul.mubr.msk.f32.gmra.mrb[4].mxu0 %vm358_vm1, %v339_v6 }
  0x23   : > { %1479 = vmatprep.mubr.msk.f32.mxu0 %vm358_vm1, %v340_v7 }
  0x26   : > { %1480 = vmatmul.mubr.msk.f32.gmra.mrb[6].mxu0 %vm358_vm1, %v341_v8 }
  0x27   : > { %1482 = vmatprep.mubr.msk.f32.mxu0 %vm358_vm1, %v342_v9 }
  0x2a   : > { %1483 = vmatmul.mubr.msk.f32.gmra.mrb[8].mxu0 %vm358_vm1, %v343_v10 }
  0x2b   : > { %1485 = vmatprep.mubr.msk.f32.mxu0 %vm358_vm1, %v344_v11 }
  0x2e   : > { %1486 = vmatmul.mubr.msk.f32.gmra.mrb[10].mxu0 %vm358_vm1, %v345_v12 }
  0x2f   : > { %1488 = vmatprep.mubr.msk.f32.mxu0 %vm358_vm1, %v346_v13 }
  0x32   : > { %1489 = vmatmul.mubr.msk.f32.gmra.mrb[12].mxu0 %vm358_vm1, %v347_v14  ;;  %v1013_v14 = vld [vmem:[%s2187_s7] sm:$0xff] }
  0x33   : > { %1491 = vmatprep.mubr.msk.f32.mxu0 %vm358_vm1, %v348_v15  ;;  %v1014_v15 = vld [vmem:[%s2187_s7 + $0x8] sm:$0xff] }
  0x34   : > { %v1606_v17 = vpack.c.bf16 %v1014_v15, %v1013_v14 }
  0x36   : > { %1492 = vmatmul.mubr.msk.f32.gmra.mrb[14].mxu0 %vm358_vm1, %v349_v16  ;;  %v1015_v16 = vld [vmem:[%s2187_s7 + $0x10] sm:$0xff]  ;;  %1607 = vmatprep.subr.bf16.mxu1 %v1606_v17 }
  0x37   : > { %v1610_v19 = vpack.c.bf16 %v1016_v18, %v1015_v16 }
  0xed   : > { %v1472_v30 = vpop.f32.mrb[0].mxu0 }
  0xee   : > { %v483_v31 = vadd.f32 %v1472_v30, %v1984_v29  ;;  %v477_v32 = vpop.f32.mrb[1].mxu0 }
  0xef   : > { %v478_v33 = vadd.f32 %v1984_v29, %v477_v32 }
  0xf1   : > { %1655 = vtanh.f32 %v478_v33  ;;  %v1475_v34 = vpop.f32.mrb[2].mxu0 }
  0xf2   : > { %1657 = vtanh.f32 %v483_v31  ;;  %v493_v35 = vadd.f32 %v1475_v34, %v1984_v29  ;;  %v487_v36 = vpop.f32.mrb[3].mxu0 }
  0xf3   : > { %v488_v37 = vadd.f32 %v1984_v29, %v487_v36 }
  0xf5   : > { %1659 = vtanh.f32 %v488_v37  ;;  %v1478_v38 = vpop.f32.mrb[4].mxu0 }
  0xf6   : > { %1661 = vtanh.f32 %v493_v35  ;;  %v503_v39 = vadd.f32 %v1478_v38, %v1984_v29  ;;  %v497_v40 = vpop.f32.mrb[5].mxu0 }
  0xf7   : > { %v498_v41 = vadd.f32 %v1984_v29, %v497_v40 }
  0xf9   : > { %1663 = vtanh.f32 %v498_v41  ;;  %v1481_v42 = vpop.f32.mrb[6].mxu0 }
  0xfa   : > { %1665 = vtanh.f32 %v503_v39  ;;  %v513_v43 = vadd.f32 %v1481_v42, %v1984_v29  ;;  %v507_v44 = vpop.f32.mrb[7].mxu0 }
  0xfb   : > { %v1656_v45 = vpop.eup %1655  ;;  %v508_v46 = vadd.f32 %v1984_v29, %v507_v44 }
  0xfc   : > { %v1658_v47 = vpop.eup %1657  ;;  %1502 = vmatprep.mubr.msk.f32.mxu1 %vm583_vm2, %v1656_v45 }
  0xfd   : > { %1667 = vtanh.f32 %v508_v46  ;;  %v1484_v48 = vpop.f32.mrb[8].mxu0  ;;  %1503 = vmatmul.mubr.msk.f32.vlgmr.msra.gmra.mrb[0].mxu1 %vm583_vm2, %v1658_v47 }
  0xfe   : > { %1669 = vtanh.f32 %v513_v43  ;;  %v523_v49 = vadd.f32 %v1484_v48, %v1984_v29  ;;  %v517_v50 = vpop.f32.mrb[9].mxu0  ;;  %1609 = vmatpush3.bf16.msra.mxu1 %v1606_v17 }
  0xff   : > { %v1660_v51 = vpop.eup %1659  ;;  %v518_v52 = vadd.f32 %v1984_v29, %v517_v50  ;;  %1611 = vmatprep.subr.bf16.mxu1 %v1610_v19 }
 0x100   : > { %v1662_v53 = vpop.eup %1661  ;;  %1505 = vmatprep.mubr.msk.f32.mxu1 %vm583_vm2, %v1660_v51 }
 0x101   : > { %1671 = vtanh.f32 %v518_v52  ;;  %v1487_v54 = vpop.f32.mrb[10].mxu0  ;;  %1506 = vmatmul.mubr.msk.f32.gmra.mrb[2].mxu1 %vm583_vm2, %v1662_v53 }
 0x102   : > { %1673 = vtanh.f32 %v523_v49  ;;  %v533_v55 = vadd.f32 %v1487_v54, %v1984_v29  ;;  %v527_v56 = vpop.f32.mrb[11].mxu0  ;;  %1613 = vmatpush3.bf16.msra.mxu1 %v1610_v19 }
 0x103   : > { %v1664_v57 = vpop.eup %1663  ;;  %v528_v58 = vadd.f32 %v1984_v29, %v527_v56 }
 0x104   : > { %v1666_v59 = vpop.eup %1665  ;;  %1508 = vmatprep.mubr.msk.f32.mxu1 %vm583_vm2, %v1664_v57 }
 0x105   : > { %1675 = vtanh.f32 %v528_v58  ;;  %v1490_v60 = vpop.f32.mrb[12].mxu0  ;;  %1509 = vmatmul.mubr.msk.f32.gmra.mrb[4].mxu1 %vm583_vm2, %v1666_v59 }
 0x106   : > { %1677 = vtanh.f32 %v533_v55  ;;  %v543_v61 = vadd.f32 %v1490_v60, %v1984_v29  ;;  %v537_v62 = vpop.f32.mrb[13].mxu0 }
 0x107   : > { %v1668_v63 = vpop.eup %1667  ;;  %v538_v0 = vadd.f32 %v1984_v29, %v537_v62 }
 0x108   : > { %v1670_v1 = vpop.eup %1669  ;;  %1511 = vmatprep.mubr.msk.f32.mxu1 %vm583_vm2, %v1668_v63 }
 0x109   : > { %1679 = vtanh.f32 %v538_v0  ;;  %v1493_v2 = vpop.f32.mrb[14].mxu0  ;;  %1512 = vmatmul.mubr.msk.f32.gmra.mrb[6].mxu1 %vm583_vm2, %v1670_v1 }
 0x10a   : > { %1681 = vtanh.f32 %v543_v61  ;;  %v553_v3 = vadd.f32 %v1493_v2, %v1984_v29  ;;  %v547_v4 = vpop.f32.mrb[15].mxu0 }
 0x10b   : > { %v1672_v5 = vpop.eup %1671  ;;  %v548_v6 = vadd.f32 %v1984_v29, %v547_v4 }
 0x10c   : > { %v1674_v7 = vpop.eup %1673  ;;  %1514 = vmatprep.mubr.msk.f32.mxu1 %vm583_vm2, %v1672_v5  ;;  %v2070_v5 = vld [vmem:[%s2186_s6] ss:$0 sm:$0xff] }
 0x10d   : > { %1683 = vtanh.f32 %v548_v6  ;;  %1515 = vmatmul.mubr.msk.f32.gmra.mrb[8].mxu1 %vm583_vm2, %v1674_v7 }
 0x10e   : > { %1685 = vtanh.f32 %v553_v3 }
 0x10f   : > { %v1676_v8 = vpop.eup %1675 }
 0x110   : > { %v1678_v9 = vpop.eup %1677  ;;  %1517 = vmatprep.mubr.msk.f32.mxu1 %vm583_vm2, %v1676_v8 }
 0x111   : > { %1518 = vmatmul.mubr.msk.f32.gmra.mrb[10].mxu1 %vm583_vm2, %v1678_v9 }
 0x113   : > { %v1680_v10 = vpop.eup %1679 }
 0x114   : > { %v1682_v11 = vpop.eup %1681  ;;  %1520 = vmatprep.mubr.msk.f32.mxu1 %vm583_vm2, %v1680_v10 }
 0x115   : > { %1521 = vmatmul.mubr.msk.f32.gmra.mrb[12].mxu1 %vm583_vm2, %v1682_v11 }
 0x117   : > { %v1684_v12 = vpop.eup %1683 }
 0x118   : > { %v1686_v13 = vpop.eup %1685  ;;  %1523 = vmatprep.mubr.msk.f32.mxu1 %vm583_vm2, %v1684_v12 }
 0x119   : > { %1524 = vmatmul.mubr.msk.f32.gmra.mrb[14].mxu1 %vm583_vm2, %v1686_v13 }
 0x1d0   : > { %v1504_v21 = vpop.f32.mrb[0].mxu1 }
 0x1d1   : > { %v704_v22 = vadd.f32 %v1504_v21, %v2033_v20  ;;  %v698_v23 = vpop.f32.mrb[1].mxu1 }
 0x1d2   : > { %v699_v24 = vadd.f32 %v2033_v20, %v698_v23 }
 0x1d4   : > { %1687 = vtanh.f32 %v699_v24  ;;  %v1507_v25 = vpop.f32.mrb[2].mxu1 }
 0x1d5   : > { %1689 = vtanh.f32 %v704_v22  ;;  %v714_v26 = vadd.f32 %v1507_v25, %v2033_v20  ;;  %v708_v27 = vpop.f32.mrb[3].mxu1 }
 0x1d6   : > { %v709_v28 = vadd.f32 %v2033_v20, %v708_v27 }
 0x1d8   : > { %1691 = vtanh.f32 %v709_v28  ;;  %v1510_v29 = vpop.f32.mrb[4].mxu1 }
 0x1d9   : > { %1693 = vtanh.f32 %v714_v26  ;;  %v724_v30 = vadd.f32 %v1510_v29, %v2033_v20  ;;  %v718_v31 = vpop.f32.mrb[5].mxu1 }
 0x1da   : > { %v719_v32 = vadd.f32 %v2033_v20, %v718_v31 }
 0x1dc   : > { %1695 = vtanh.f32 %v719_v32  ;;  %v1513_v33 = vpop.f32.mrb[6].mxu1 }
 0x1dd   : > { %1697 = vtanh.f32 %v724_v30  ;;  %v734_v34 = vadd.f32 %v1513_v33, %v2033_v20  ;;  %v728_v35 = vpop.f32.mrb[7].mxu1 }
 0x1de   : > { %v1688_v36 = vpop.eup %1687  ;;  %v729_v37 = vadd.f32 %v2033_v20, %v728_v35 }
 0x1df   : > { %v1690_v38 = vpop.eup %1689  ;;  %1534 = vmatprep.mubr.msk.f32.mxu0 %vm583_vm2, %v1688_v36 }
 0x1e0   : > { %1699 = vtanh.f32 %v729_v37  ;;  %v1516_v39 = vpop.f32.mrb[8].mxu1  ;;  %1535 = vmatmul.mubr.msk.f32.vlgmr.msra.gmra.mrb[16].mxu0 %vm583_vm2, %v1690_v38 }
 0x1e1   : > { %1701 = vtanh.f32 %v734_v34  ;;  %v744_v40 = vadd.f32 %v1516_v39, %v2033_v20  ;;  %v738_v41 = vpop.f32.mrb[9].mxu1 }
 0x1e2   : > { %v1692_v42 = vpop.eup %1691  ;;  %v739_v43 = vadd.f32 %v2033_v20, %v738_v41 }
 0x1e3   : > { %v1694_v44 = vpop.eup %1693  ;;  %1537 = vmatprep.mubr.msk.f32.mxu0 %vm583_vm2, %v1692_v42 }
 0x1e4   : > { %1703 = vtanh.f32 %v739_v43  ;;  %v1519_v45 = vpop.f32.mrb[10].mxu1  ;;  %1538 = vmatmul.mubr.msk.f32.gmra.mrb[18].mxu0 %vm583_vm2, %v1694_v44 }
 0x1e5   : > { %1705 = vtanh.f32 %v744_v40  ;;  %v754_v46 = vadd.f32 %v1519_v45, %v2033_v20  ;;  %v748_v47 = vpop.f32.mrb[11].mxu1 }
 0x1e6   : > { %v1696_v48 = vpop.eup %1695  ;;  %v749_v49 = vadd.f32 %v2033_v20, %v748_v47 }
 0x1e7   : > { %v1698_v50 = vpop.eup %1697  ;;  %1540 = vmatprep.mubr.msk.f32.mxu0 %vm583_vm2, %v1696_v48 }
 0x1e8   : > { %1707 = vtanh.f32 %v749_v49  ;;  %v1522_v51 = vpop.f32.mrb[12].mxu1  ;;  %1541 = vmatmul.mubr.msk.f32.gmra.mrb[20].mxu0 %vm583_vm2, %v1698_v50 }
 0x1e9   : > { %1709 = vtanh.f32 %v754_v46  ;;  %v764_v52 = vadd.f32 %v1522_v51, %v2033_v20  ;;  %v758_v53 = vpop.f32.mrb[13].mxu1 }
 0x1ea   : > { %v1700_v54 = vpop.eup %1699  ;;  %v759_v55 = vadd.f32 %v2033_v20, %v758_v53 }
 0x1eb   : > { %v1702_v56 = vpop.eup %1701  ;;  %1543 = vmatprep.mubr.msk.f32.mxu0 %vm583_vm2, %v1700_v54  ;;  %v1368_v54 = vld [vmem:[%s2188_s8] ss:$0 sm:$0xff] }
 0x1ec   : > { %1711 = vtanh.f32 %v759_v55  ;;  %v1525_v57 = vpop.f32.mrb[14].mxu1  ;;  %1544 = vmatmul.mubr.msk.f32.gmra.mrb[22].mxu0 %vm583_vm2, %v1702_v56 }
 0x1ed   : > { %1713 = vtanh.f32 %v764_v52  ;;  %v774_v58 = vadd.f32 %v1525_v57, %v2033_v20  ;;  %v768_v59 = vpop.f32.mrb[15].mxu1 }
 0x1ee   : > { %v1704_v60 = vpop.eup %1703  ;;  %v769_v61 = vadd.f32 %v2033_v20, %v768_v59 }
 0x1ef   : > { %v1706_v62 = vpop.eup %1705  ;;  %1546 = vmatprep.mubr.msk.f32.mxu0 %vm583_vm2, %v1704_v60 }
 0x1f0   : > { %1715 = vtanh.f32 %v769_v61  ;;  %1547 = vmatmul.mubr.msk.f32.gmra.mrb[24].mxu0 %vm583_vm2, %v1706_v62 }
 0x1f1   : > { %1717 = vtanh.f32 %v774_v58 }
 0x1f2   : > { %v1708_v63 = vpop.eup %1707 }
 0x1f3   : > { %v1710_v0 = vpop.eup %1709  ;;  %1549 = vmatprep.mubr.msk.f32.mxu0 %vm583_vm2, %v1708_v63 }
 0x1f4   : > { %1550 = vmatmul.mubr.msk.f32.gmra.mrb[26].mxu0 %vm583_vm2, %v1710_v0 }
 0x1f6   : > { %v1712_v1 = vpop.eup %1711 }
 0x1f7   : > { %v1714_v2 = vpop.eup %1713  ;;  %1552 = vmatprep.mubr.msk.f32.mxu0 %vm583_vm2, %v1712_v1 }
 0x1f8   : > { %1553 = vmatmul.mubr.msk.f32.gmra.mrb[28].mxu0 %vm583_vm2, %v1714_v2 }
 0x1fa   : > { %v1716_v3 = vpop.eup %1715 }
 0x1fb   : > { %v1718_v4 = vpop.eup %1717  ;;  %1555 = vmatprep.mubr.msk.f32.mxu0 %vm583_vm2, %v1716_v3 }
 0x1fc   : > { %1556 = vmatmul.mubr.msk.f32.gmra.mrb[30].mxu0 %vm583_vm2, %v1718_v4 }
 0x2b3   : > { %v1536_v6 = vpop.f32.mrb[16].mxu0 }
 0x2b4   : > { %v924_v7 = vadd.f32 %v1536_v6, %v2070_v5  ;;  %v918_v8 = vpop.f32.mrb[17].mxu0 }
 0x2b5   : > { %v919_v9 = vadd.f32 %v2070_v5, %v918_v8 }
 0x2b7   : > { %1719 = vtanh.f32 %v919_v9  ;;  %v1539_v10 = vpop.f32.mrb[18].mxu0 }
 0x2b8   : > { %1721 = vtanh.f32 %v924_v7  ;;  %v934_v11 = vadd.f32 %v1539_v10, %v2070_v5  ;;  %v928_v12 = vpop.f32.mrb[19].mxu0 }
 0x2b9   : > { %v929_v13 = vadd.f32 %v2070_v5, %v928_v12 }
 0x2bb   : > { %1723 = vtanh.f32 %v929_v13  ;;  %v1542_v14 = vpop.f32.mrb[20].mxu0 }
 0x2bc   : > { %1725 = vtanh.f32 %v934_v11  ;;  %v944_v15 = vadd.f32 %v1542_v14, %v2070_v5  ;;  %v938_v16 = vpop.f32.mrb[21].mxu0 }
 0x2bd   : > { %v939_v17 = vadd.f32 %v2070_v5, %v938_v16 }
 0x2bf   : > { %1727 = vtanh.f32 %v939_v17  ;;  %v1545_v18 = vpop.f32.mrb[22].mxu0 }
 0x2c0   : > { %1729 = vtanh.f32 %v944_v15  ;;  %v954_v19 = vadd.f32 %v1545_v18, %v2070_v5  ;;  %v948_v20 = vpop.f32.mrb[23].mxu0 }
 0x2c1   : > { %v1720_v21 = vpop.eup %1719  ;;  %v949_v22 = vadd.f32 %v2070_v5, %v948_v20 }
 0x2c2   : > { %v1722_v23 = vpop.eup %1721  ;;  %1566 = vmatprep.mubr.msk.f32.mxu1 %vm583_vm2, %v1720_v21 }
 0x2c3   : > { %1731 = vtanh.f32 %v949_v22  ;;  %v1548_v24 = vpop.f32.mrb[24].mxu0  ;;  %1567 = vmatmul.mubr.msk.f32.vlgmr.msra.gmra.mrb[16].mxu1 %vm583_vm2, %v1722_v23 }
 0x2c4   : > { %1733 = vtanh.f32 %v954_v19  ;;  %v964_v25 = vadd.f32 %v1548_v24, %v2070_v5  ;;  %v958_v26 = vpop.f32.mrb[25].mxu0 }
 0x2c5   : > { %v1724_v27 = vpop.eup %1723  ;;  %v959_v28 = vadd.f32 %v2070_v5, %v958_v26 }
 0x2c6   : > { %v1726_v29 = vpop.eup %1725  ;;  %1569 = vmatprep.mubr.msk.f32.mxu1 %vm583_vm2, %v1724_v27 }
 0x2c7   : > { %1735 = vtanh.f32 %v959_v28  ;;  %v1551_v30 = vpop.f32.mrb[26].mxu0  ;;  %1570 = vmatmul.mubr.msk.f32.gmra.mrb[18].mxu1 %vm583_vm2, %v1726_v29 }
 0x2c8   : > { %1737 = vtanh.f32 %v964_v25  ;;  %v974_v31 = vadd.f32 %v1551_v30, %v2070_v5  ;;  %v968_v32 = vpop.f32.mrb[27].mxu0 }
 0x2c9   : > { %v1728_v33 = vpop.eup %1727  ;;  %v969_v34 = vadd.f32 %v2070_v5, %v968_v32 }
 0x2ca   : > { %v1730_v35 = vpop.eup %1729  ;;  %1572 = vmatprep.mubr.msk.f32.mxu1 %vm583_vm2, %v1728_v33 }
 0x2cb   : > { %1739 = vtanh.f32 %v969_v34  ;;  %v1554_v36 = vpop.f32.mrb[28].mxu0  ;;  %1573 = vmatmul.mubr.msk.f32.gmra.mrb[20].mxu1 %vm583_vm2, %v1730_v35 }
 0x2cc   : > { %1741 = vtanh.f32 %v974_v31  ;;  %v984_v37 = vadd.f32 %v1554_v36, %v2070_v5  ;;  %v978_v38 = vpop.f32.mrb[29].mxu0 }
 0x2cd   : > { %v1732_v39 = vpop.eup %1731  ;;  %v979_v40 = vadd.f32 %v2070_v5, %v978_v38 }
 0x2ce   : > { %v1734_v41 = vpop.eup %1733  ;;  %1575 = vmatprep.mubr.msk.f32.mxu1 %vm583_vm2, %v1732_v39 }
 0x2cf   : > { %1743 = vtanh.f32 %v979_v40  ;;  %v1557_v42 = vpop.f32.mrb[30].mxu0  ;;  %1576 = vmatmul.mubr.msk.f32.gmra.mrb[22].mxu1 %vm583_vm2, %v1734_v41 }
 0x2d0   : > { %1745 = vtanh.f32 %v984_v37  ;;  %v994_v43 = vadd.f32 %v1557_v42, %v2070_v5  ;;  %v988_v44 = vpop.f32.mrb[31].mxu0 }
 0x2d1   : > { %v1736_v45 = vpop.eup %1735  ;;  %v989_v46 = vadd.f32 %v2070_v5, %v988_v44 }
 0x2d2   : > { %v1738_v47 = vpop.eup %1737  ;;  %1578 = vmatprep.mubr.msk.f32.mxu1 %vm583_vm2, %v1736_v45 }
 0x2d3   : > { %1747 = vtanh.f32 %v989_v46  ;;  %1579 = vmatmul.mubr.msk.f32.gmra.mrb[24].mxu1 %vm583_vm2, %v1738_v47 }
 0x2d4   : > { %1749 = vtanh.f32 %v994_v43 }
 0x2d5   : > { %v1740_v48 = vpop.eup %1739 }
 0x2d6   : > { %v1742_v49 = vpop.eup %1741  ;;  %1581 = vmatprep.mubr.msk.f32.mxu1 %vm583_vm2, %v1740_v48 }
 0x2d7   : > { %1582 = vmatmul.mubr.msk.f32.gmra.mrb[26].mxu1 %vm583_vm2, %v1742_v49 }
 0x2d9   : > { %v1744_v50 = vpop.eup %1743 }
 0x2da   : > { %v1746_v51 = vpop.eup %1745  ;;  %1584 = vmatprep.mubr.msk.f32.mxu1 %vm583_vm2, %v1744_v50 }
 0x2db   : > { %1585 = vmatmul.mubr.msk.f32.gmra.mrb[28].mxu1 %vm583_vm2, %v1746_v51 }
 0x2dd   : > { %v1748_v52 = vpop.eup %1747 }
 0x2de   : > { %v1750_v53 = vpop.eup %1749  ;;  %1587 = vmatprep.mubr.msk.f32.mxu1 %vm583_vm2, %v1748_v52 }
 0x2df   : > { %1588 = vmatmul.mubr.msk.f32.gmra.mrb[30].mxu1 %vm583_vm2, %v1750_v53 }
 0x396   : > { %v1568_v55 = vpop.f32.mrb[16].mxu1 }
 0x397   : > { %v1144_v56 = vadd.f32 %v1568_v55, %v1368_v54  ;;  %v1138_v57 = vpop.f32.mrb[17].mxu1 }
 0x398   : > { %v1139_v58 = vadd.f32 %v1368_v54, %v1138_v57 }
 0x399   : > { %1218 = vst [vmem:[%s2110_s26 + $0x8] sm:$0xff] %v1144_v56 }
 0x39a   : > { %1217 = vst [vmem:[%s2110_s26] sm:$0xff] %v1139_v58  ;;  %v1571_v59 = vpop.f32.mrb[18].mxu1 }
 0x39b   : > { %v1154_v60 = vadd.f32 %v1571_v59, %v1368_v54  ;;  %v1148_v61 = vpop.f32.mrb[19].mxu1 }
 0x39c   : > { %v1149_v62 = vadd.f32 %v1368_v54, %v1148_v61 }
 0x39d   : > { %1220 = vst [vmem:[%s2110_s26 + $0x18] sm:$0xff] %v1154_v60 }
 0x39e   : > { %1219 = vst [vmem:[%s2110_s26 + $0x10] sm:$0xff] %v1149_v62  ;;  %v1574_v63 = vpop.f32.mrb[20].mxu1 }
 0x39f   : > { %v1164_v0 = vadd.f32 %v1574_v63, %v1368_v54  ;;  %v1158_v1 = vpop.f32.mrb[21].mxu1 }
 0x3a0   : > { %v1159_v2 = vadd.f32 %v1368_v54, %v1158_v1 }
 0x3a1   : > { %1222 = vst [vmem:[%s2110_s26 + $0x28] sm:$0xff] %v1164_v0 }
 0x3a2   : > { %1221 = vst [vmem:[%s2110_s26 + $0x20] sm:$0xff] %v1159_v2  ;;  %v1577_v3 = vpop.f32.mrb[22].mxu1 }
 0x3a3   : > { %v1174_v4 = vadd.f32 %v1577_v3, %v1368_v54  ;;  %v1168_v5 = vpop.f32.mrb[23].mxu1 }
 0x3a4   : > { %v1169_v6 = vadd.f32 %v1368_v54, %v1168_v5 }
 0x3a5   : > { %1224 = vst [vmem:[%s2110_s26 + $0x38] sm:$0xff] %v1174_v4 }
 0x3a6   : > { %1223 = vst [vmem:[%s2110_s26 + $0x30] sm:$0xff] %v1169_v6  ;;  %v1580_v7 = vpop.f32.mrb[24].mxu1 }
 0x3a7   : > { %v1184_v8 = vadd.f32 %v1580_v7, %v1368_v54  ;;  %v1178_v9 = vpop.f32.mrb[25].mxu1 }
 0x3a8   : > { %v1179_v10 = vadd.f32 %v1368_v54, %v1178_v9 }
 0x3a9   : > { %1226 = vst [vmem:[%s2110_s26 + $0x48] sm:$0xff] %v1184_v8 }
 0x3aa   : > { %1225 = vst [vmem:[%s2110_s26 + $0x40] sm:$0xff] %v1179_v10  ;;  %v1583_v11 = vpop.f32.mrb[26].mxu1 }
 0x3ab   : > { %v1194_v12 = vadd.f32 %v1583_v11, %v1368_v54  ;;  %v1188_v13 = vpop.f32.mrb[27].mxu1 }
 0x3ac   : > { %v1189_v14 = vadd.f32 %v1368_v54, %v1188_v13 }
 0x3ad   : > { %1228 = vst [vmem:[%s2110_s26 + $0x58] sm:$0xff] %v1194_v12 }
 0x3ae   : > { %1227 = vst [vmem:[%s2110_s26 + $0x50] sm:$0xff] %v1189_v14  ;;  %v1586_v15 = vpop.f32.mrb[28].mxu1 }
 0x3af   : > { %v1204_v16 = vadd.f32 %v1586_v15, %v1368_v54  ;;  %v1198_v17 = vpop.f32.mrb[29].mxu1 }
 0x3b0   : > { %v1199_v18 = vadd.f32 %v1368_v54, %v1198_v17 }
 0x3b1   : > { %1230 = vst [vmem:[%s2110_s26 + $0x68] sm:$0xff] %v1204_v16 }
 0x3b2   : > { %1229 = vst [vmem:[%s2110_s26 + $0x60] sm:$0xff] %v1199_v18  ;;  %v1589_v19 = vpop.f32.mrb[30].mxu1 }
 0x3b3   : > { %v1214_v20 = vadd.f32 %v1589_v19, %v1368_v54  ;;  %v1208_v21 = vpop.f32.mrb[31].mxu1 }
 0x3b4   : > { %v1209_v22 = vadd.f32 %v1368_v54, %v1208_v21 }
 0x3b5   : > { %1232 = vst [vmem:[%s2110_s26 + $0x78] sm:$0xff] %v1214_v20 }
 0x3b6   : > { %1231 = vst [vmem:[%s2110_s26 + $0x70] sm:$0xff] %v1209_v22 }
 0x3b7   : > { %1764 = shalt.err (!%p1761_p3)
}
 0x3b8   : > { %s1765_s22 = scalar_lea.hbm %s2131_s16, 2048  ;;  %s1769_s27 = scalar_lea.hbm %s2189_s9, 6144 }
 0x3b9   : > { %p1766_p4 = scmp.ne.s32.totalorder %s2131_s16, %s1765_s22  ;;  %p1770_p9 = scmp.lt.u32.totalorder %s2131_s16, %s2189_s9 }
 0x3ba   : > { %p1771_p10 = scmp.lt.u32.totalorder %s1769_s27, %s1765_s22  ;;  %p1773_p12 = scmp.lt.u32.totalorder %s1765_s22, %s2131_s16 }
 0x3bb   : > { %p1767_p7 = pnand %p1766_p4, %p1906_p5 }
 0x3bc   : > { %p1772_p11 = por %p1771_p10, %p1770_p9 }
 0x3bd   : > { %p1768_p8 = pneg %p1767_p7 }
 0x3be   : > { %p1774_p13 = por %p1773_p12, %p1772_p11 }
 0x3c0   : > { %p1775_p0 = pnand %p1774_p13, %p1768_p8 }
 0x3c2   : > { %1778 = shalt.err (!%p1775_p0)
}
 0x3c3   : > { %s1816_s17 = smov 128   ;;  %s1817_s21 = smov 8  }
 0x3c4   : > { %1614 = dma.vmem_to_hbm [thread:$0]  (%p1906_p5), %s2133_s28, 2048, %s2131_s16, %s2139_s13, %s1816_s17, %s1816_s17, %s1817_s21  }
 0x3c5 PF: > { %p1620_p1 = scmp.ge.s32.totalorder %s1813_s12, 2  ;;  %s1262_s23 = sand.u32 1, %s1801_s30  }
 0x3c6   : > { %s1263_s24 = scalar_lea.sflag [#allocation3], %s1262_s23 }
 0x3c7   : > { %p1617_p2 = pnand %p1620_p1, %p1910_p6 }
 0x3c9   : > { %1796 = dma.done.wait (!%p1617_p2), %s1263_s24, 2048  }
 0x3ca   : > { %1798 = vsyncadd (!%p1617_p2), %s1263_s24, 4294965248  ;;  %p19_p3 = scmp.ge.s32.totalorder %s1893_s15, 5   ;;  %s2192_s30 = smov %s1805_s10 }
 0x3cb   : > { %s2193_s10 = smov %s1809_s11  ;;  %s2194_s11 = smov %s1904_s18 }
 0x3cc   : > { %s2195_s12 = smov %s1893_s15  ;;  %21 = sbr.rel (!%p19_p3) target bundleno = 3 (0x3), region = 91 }
 0x3d3   :  { %1268 = vsyncpa [#allocation3], 1 }
 0x3d4   :  { %1270 = vsyncpa [#allocation3 + $0x1], 1 }

</bundles_post_ra>
